<compile_context>
chip_gen: v5e
topology: v5e:2x2
jax: 0.10.0
libtpu: 0.0.40
codegen_flags: <defaults>
</compile_context>

<pallas_src>
import functools

import jax
import jax.numpy as jnp
from jax.experimental import pallas as pl
from jax.experimental.pallas import tpu as pltpu


# ---------------------------------------------------------------------------
# Kernels — x / out tiles are lane-dense (ts, B*D); pe tiles are (ts, D) and
# broadcast over the batch axis in-kernel.
# ---------------------------------------------------------------------------

def _bcast_pe(pe_ref, x_dtype, batch):
    pe = pe_ref[...].astype(x_dtype)              # (ts, D)
    if batch > 1:
        pe = jnp.tile(pe, (1, batch))             # (ts, B*D): lane replication
    return pe


def _add_pe_kernel(x_ref, pe_ref, o_ref, *, batch):
    # Eval mode / p == 0: dropout is the identity.
    pe = _bcast_pe(pe_ref, x_ref.dtype, batch)
    o_ref[...] = (x_ref[...] + pe).astype(o_ref.dtype)


def _add_pe_mask_kernel(x_ref, pe_ref, m_ref, o_ref, *, batch):
    # Non-TPU fallback: pre-scaled f32 keep mask generated in the wrapper.
    pe = _bcast_pe(pe_ref, x_ref.dtype, batch)
    y = (x_ref[...] + pe).astype(jnp.float32)
    o_ref[...] = (y * m_ref[...]).astype(o_ref.dtype)


def _add_pe_prng_kernel(seed_ref, x_ref, pe_ref, o_ref, *, p, batch):
    # TPU training path: in-kernel hardware PRNG; per-tile seed so every grid
    # step draws an independent mask.  Caller must vary `seed` per step.
    pltpu.prng_seed(seed_ref[0] + pl.program_id(0))
    pe = _bcast_pe(pe_ref, x_ref.dtype, batch)
    y = x_ref[...] + pe
    bits = pltpu.prng_random_bits(y.shape)
    if bits.dtype != jnp.uint32:
        bits = pltpu.bitcast(bits, jnp.uint32)
    # P(keep) = 1 - p to within 2^-32 (the clamp makes p -> 1 behave as
    # keep-prob ~ 2^-32 rather than exactly 0 — negligible, documented).
    thresh = jnp.uint32(min(int(p * 2 ** 32), 2 ** 32 - 1))
    keep = bits >= thresh
    # Inverted-dropout scale in f32; cast only the final result back.
    y32 = y.astype(jnp.float32) * jnp.float32(1.0 / (1.0 - p))
    o_ref[...] = jnp.where(keep, y32, jnp.zeros_like(y32)).astype(o_ref.dtype)


# ---------------------------------------------------------------------------
# Wrapper
# ---------------------------------------------------------------------------

_TARGET_BLOCK_BYTES = 4 << 20   # ~4 MiB per full-size (x / out) block: hides the
                                # ~0.35 us/grid-step overhead even at v7x's
                                # ~3.2 TB/s HBM; 2 full-size + 1 small operand
                                # double-buffered stays well under 48 MiB.
_VMEM_LIMIT_BYTES = 48 << 20    # explicit scoped-VMEM limit: safe on v5e/v6e
                                # (128 MiB physical) and v7x (64 MiB physical).


def _choose_tile_s(S, row_bytes):
    """Sublane-aligned tile along S targeting ~4 MiB x/out blocks."""
    if S <= 8:
        return S                                   # full-dim block (always legal)
    ts = _TARGET_BLOCK_BYTES // max(row_bytes, 1)
    ts = max(8, (ts // 8) * 8)                     # sublane-aligned
    if S >= 32:
        # Keep the "parallel" S grid at >= 4 steps so both TensorCores get
        # work on v7x megacore; extra step overhead is negligible at this size.
        ts = min(ts, max(8, (S // 4 // 8) * 8))
    return min(ts, S)


def positional_embedding(x, pos_emb_table, *, p=0.1, training=False, seed=0,
                         donate_x=False):
    """x: (S, B, D); pos_emb_table: (max_len, D).  Returns (S, B, D).

    NOTE: for tiny activations a standalone pallas_call is dominated by launch
    overhead; in a full model this add + dropout should be fused into the
    neighbouring kernel.
    # TODO(synk): fuse into the adjacent attention/projection kernel at model scale.
    """
    S, B, D = x.shape
    max_len = pos_emb_table.shape[0]
    assert S <= max_len, "sequence longer than the positional-embedding table"
    N = B * D
    dt = x.dtype

    x2 = x.reshape(S, N)                           # free row-major view

    ts = _choose_tile_s(S, N * jnp.dtype(dt).itemsize)
    grid = (pl.cdiv(S, ts),)
    cparams = pltpu.CompilerParams(dimension_semantics=("parallel",),
                                   vmem_limit_bytes=_VMEM_LIMIT_BYTES)
    out_shape = jax.ShapeDtypeStruct((S, N), dt)

    x_blk = pl.BlockSpec((ts, N), lambda i: (i, 0))
    pe_blk = pl.BlockSpec((ts, D), lambda i: (i, 0))   # rows of the raw table

    if training and p > 0.0:
        if jax.default_backend() == "tpu":
            kernel = functools.partial(_add_pe_prng_kernel, p=float(p), batch=B)
            out2 = pl.pallas_call(
                kernel,
                out_shape=out_shape,
                grid_spec=pltpu.PrefetchScalarGridSpec(
                    num_scalar_prefetch=1,
                    grid=grid,
                    in_specs=[pl.BlockSpec((ts, N), lambda i, s: (i, 0)),
                              pl.BlockSpec((ts, D), lambda i, s: (i, 0))],
                    out_specs=pl.BlockSpec((ts, N), lambda i, s: (i, 0)),
                ),
                compiler_params=cparams,
                input_output_aliases={1: 0} if donate_x else {},
            )(jnp.array([seed], dtype=jnp.int32), x2, pos_emb_table)
        else:
            # Non-TPU backends (CPU / interpret): hardware PRNG unavailable, so
            # build a pre-scaled f32 keep mask with jax.random in the wrapper.
            key = jax.random.PRNGKey(seed)
            keep = jax.random.bernoulli(key, 1.0 - p, (S, N))
            mask = keep.astype(jnp.float32) * jnp.float32(1.0 / (1.0 - p))
            out2 = pl.pallas_call(
                functools.partial(_add_pe_mask_kernel, batch=B),
                out_shape=out_shape,
                grid=grid,
                in_specs=[x_blk, pe_blk, x_blk],
                out_specs=x_blk,
                compiler_params=cparams,
                input_output_aliases={0: 0} if donate_x else {},
            )(x2, pos_emb_table, mask)
    else:
        out2 = pl.pallas_call(
            functools.partial(_add_pe_kernel, batch=B),
            out_shape=out_shape,
            grid=grid,
            in_specs=[x_blk, pe_blk],
            out_specs=x_blk,
            compiler_params=cparams,
            input_output_aliases={0: 0} if donate_x else {},
        )(x2, pos_emb_table)

    return out2.reshape(S, B, D)


if __name__ == "__main__":
    # Small shapes consistent with the module: seq=8, batch=2, d_model=32.
    S, B, D = 8, 2, 32
    MAX_LEN = 120

    key = jax.random.PRNGKey(0)
    kx, kt = jax.random.split(key)
    x = jax.random.normal(kx, (S, B, D), dtype=jnp.float32)
    # Deterministic stand-in for embedding(max_len, d_model) weights.
    pos_emb_table = jax.random.normal(kt, (MAX_LEN, D), dtype=jnp.float32)

    # Eval mode (dropout = identity) -> deterministic check vs. reference.
    out_eval = jax.block_until_ready(
        positional_embedding(x, pos_emb_table, p=0.1, training=False))
    ref = x + pos_emb_table[:S][:, None, :]
    assert out_eval.shape == (S, B, D)
    assert jnp.allclose(out_eval, ref, atol=1e-6), "eval-mode mismatch"

    # Training mode (inverted dropout): every element is 0 or ref/(1-p).
    p = 0.1
    out_train = jax.block_until_ready(
        positional_embedding(x, pos_emb_table, p=p, training=True, seed=1234))
    assert out_train.shape == (S, B, D)
    scaled = ref / (1.0 - p)
    ok = jnp.all((jnp.abs(out_train) <= 1e-6) |
                 (jnp.abs(out_train - scaled) <= 1e-3))
    assert bool(ok), "training-mode dropout values out of range"

    print("KERNEL_OK")
</pallas_src>

<mosaic_0001>
module attributes {stable_mosaic.version = 11 : i64} {
  func.func @_add_pe_kernel(%arg0: i32, %arg1: memref<8x64xf32, #tpu.memory_space<vmem>>, %arg2: memref<8x32xf32, #tpu.memory_space<vmem>>, %arg3: memref<8x64xf32, #tpu.memory_space<vmem>>) attributes {dimension_semantics = [#tpu.dimension_semantics<parallel>], iteration_bounds = array<i64: 1>, scalar_prefetch = 0 : i64, scratch_operands = 0 : i64, tpu.core_type = #tpu.core_type<tc>, window_params = [{transform_indices = @transform_0, window_bounds = array<i64: 8, 64>}, {transform_indices = @transform_1, window_bounds = array<i64: 8, 32>}, {transform_indices = @transform_2, window_bounds = array<i64: 8, 64>}]} {
    %c0 = arith.constant 0 : index
    %c0_0 = arith.constant 0 : index
    %0 = vector.load %arg2[%c0, %c0_0] : memref<8x32xf32, #tpu.memory_space<vmem>>, vector<8x32xf32>
    %1 = tpu.concatenate %0, %0 in 1 : vector<8x32xf32>, vector<8x32xf32> -> vector<8x64xf32>
    %c0_1 = arith.constant 0 : index
    %c0_2 = arith.constant 0 : index
    %2 = vector.load %arg1[%c0_1, %c0_2] : memref<8x64xf32, #tpu.memory_space<vmem>>, vector<8x64xf32>
    %3 = arith.addf %2, %1 : vector<8x64xf32>
    %c0_3 = arith.constant 0 : index
    %c0_4 = arith.constant 0 : index
    %4 = vector.load %arg3[%c0_3, %c0_4] : memref<8x64xf32, #tpu.memory_space<vmem>>, vector<8x64xf32>
    tpu.vector_store %arg3[%c0_3, %c0_4], %3 {strides = array<i32>} : memref<8x64xf32, #tpu.memory_space<vmem>>, vector<8x64xf32>,
    return
  }
  func.func @transform_0(%arg0: i32) -> (i32, i32) {
    %c0_i32 = arith.constant 0 : i32
    %c0_i32_0 = arith.constant 0 : i32
    return %arg0, %c0_i32 : i32, i32
  }
  func.func @transform_1(%arg0: i32) -> (i32, i32) {
    %c0_i32 = arith.constant 0 : i32
    %c0_i32_0 = arith.constant 0 : i32
    return %arg0, %c0_i32 : i32, i32
  }
  func.func @transform_2(%arg0: i32) -> (i32, i32) {
    %c0_i32 = arith.constant 0 : i32
    %c0_i32_0 = arith.constant 0 : i32
    return %arg0, %c0_i32 : i32, i32
  }
}

</mosaic_0001>

<bundles_post_ra>
// kernel: tpu_custom_call.1
= control target key start
LH: loop header
LB: loop body
LE: loop exit
PB: predicated region body
PF: predicated region fallthrough
CT: control target
= control target key end

     0   :  { %s93_s0 = inlined_call_operand.vmem [shape: f32[8,64], index: 0, kind: input, shape index: {}]   ;;  %s94_s1 = inlined_call_operand.vmem [shape: f32[120,32], index: 1, kind: input, shape index: {}]   ;;  %s95_s2 = inlined_call_operand.hbm [shape: f32[8,64], index: 2, kind: output, shape index: {}]  }
   0x1   :  { %v12_v0 = vld [vmem:[%s94_s1] sm:$0xff] }
   0x2   :  { %7 = vsyncpa [#allocation3], 0  ;;  %s67_s11 = smov 32   ;;  %vm17_vm0 = vcmask 261120   ;;  %v19_v1 = vld [vmem:[%s93_s0] sm:$0xff]  ;;  %s68_s14 = smov [#allocation2]  }
   0x3   :  { %14 = vrot.lane.b32.xlu0 %v12_v0, %s67_s11  ;;  %s28_s15 = sshll.u32 %s68_s14, 4  ;;  %s30_s18 = sshll.u32 %s95_s2, 4  ;;  %vm21_vm1 = vcmask 523264   ;;  %s29_s15 = int_to_ptr.vmem [resolvable:$true] %s28_s15  ;;  %s31_s18 = int_to_ptr.hbm [resolvable:$true] %s30_s18 }
  0x75   :  { %v15_v2 = vpop.permute.xlu0 %14 }
  0x76   :  { %v18_v3 = vsel %vm17_vm0, %v12_v0, %v15_v2 }
  0x77   :  { %v20_v4 = vadd.f32 %v19_v1, %v18_v3 }
  0x79   :  { %22 = vst.msk [vmem:[#allocation2] sm:$0xff] %vm21_vm1, %v20_v4 }
  0x7a   :  { %33 = dma.vmem_to_hbm [thread:$0]  %s29_s15, 128, %s31_s18, [#allocation3]  }
  0x7b   :  { %65 = dma.done.wait [#allocation3], 128  }
  0x7c   :  { %66 = vsyncadd [#allocation3], 4294967168 }
  0x7d   :  { %38 = vsyncpa [#allocation3], 1 }

</bundles_post_ra>
